<compile_context>
chip_gen: v6e
topology: v6e:2x2x1
jax: 0.10.0
libtpu: 0.0.40
codegen_flags: <defaults>
</compile_context>

<pallas_src>
import jax
import jax.numpy as jnp
from jax.experimental import pallas as pl
from jax.experimental.pallas import tpu as pltpu

LANE = 128


def _pad_to(n, m):
    return ((n + m - 1) // m) * m


def decoder_kernel(h_ref, w_ref, b_ref, o_ref):
    # h_ref: (B, D)   bf16  encoder output, resident across the whole grid
    # w_ref: (D, tn)  bf16  pre-tiled decoder weight tile (one contiguous DMA)
    # b_ref: (1, tn)  f32   bias tile
    # o_ref: (B, tn)  f32   output tile (last grid step is lane-masked to Nsongs)
    o_ref[...] = (
        jnp.dot(h_ref[...], w_ref[...], preferred_element_type=jnp.float32)
        + b_ref[...]
    )


def _choose_tile(nsongs, d, *, target_tile, max_batch_hint, vmem_budget_bytes):
    """Lane-aligned output-tile width that (a) keeps the double-buffered tile
    footprint inside a conservative VMEM budget (safe on v5e/v6e/v7x default
    scoped VMEM) and (b) minimizes Nsongs padding (< 128*n_tiles columns)."""
    np_min = _pad_to(nsongs, LANE)
    # double-buffered bytes per output column: bf16 weight rows + f32 out rows + f32 bias
    col_bytes = 2 * (d * 2 + max_batch_hint * 4 + 4)
    cap = max(LANE, (vmem_budget_bytes // col_bytes) // LANE * LANE)
    tgt = max(LANE, min(target_tile, cap, np_min))
    n_tiles = pl.cdiv(np_min, tgt)
    return _pad_to(pl.cdiv(nsongs, n_tiles), LANE)


def make_model(emb_table, inv_w, inv_b, *, target_tile=32 * 1024,
               max_batch_hint=8, vmem_budget_bytes=12 << 20):
    """One-time parameter preparation; returns forward(x) -> (xhat, None)."""
    Nsongs, D = inv_w.shape

    # --- hoisted out of the hot path (done once at init) ---------------------
    # with torch.no_grad(): self.emb.weight[0] = 0   (padding_idx=0 semantics)
    emb_z = emb_table.at[0].set(0.0).astype(jnp.float32)

    tn = _choose_tile(Nsongs, D, target_tile=target_tile,
                      max_batch_hint=max_batch_hint,
                      vmem_budget_bytes=vmem_budget_bytes)
    grid_n = pl.cdiv(Nsongs, tn)
    Np = tn * grid_n

    # Decoder weight stored pre-tiled (grid_n, D, tn) in bf16 so each grid step
    # is a single contiguous HBM->VMEM DMA; this stream is the HBM-BW bound.
    w_pad = (
        jnp.zeros((D, Np), jnp.bfloat16)
        .at[:, :Nsongs]
        .set(jnp.transpose(inv_w).astype(jnp.bfloat16))
    )
    w_tiles = jnp.transpose(w_pad.reshape(D, grid_n, tn), (1, 0, 2))  # (grid_n, D, tn)
    b_pad = (
        jnp.zeros((1, Np), jnp.float32)
        .at[:, :Nsongs]
        .set(inv_b.astype(jnp.float32))
    )

    def forward(x):
        B, S = x.shape

        # ----- encoder (gather is index glue; plain JAX) ----------------------
        # TODO(synk): for very large B*S the XLA gather + mean could be fused
        # into a Pallas scalar-prefetch gather kernel; negligible at these sizes.
        e = jnp.take(emb_z, x + 1, axis=0)                      # (B, S, D)
        h = jnp.sum(e, axis=1)                                  # (B, D)
        nitems = jnp.sum((x != 0).astype(jnp.float32), axis=1)  # (B,)
        # NOTE: all-padding row -> inf/nan, exactly like the PyTorch module.
        h = (h / nitems[:, None]).astype(jnp.bfloat16)          # (B, D) bf16

        # ----- decoder: xhat = h @ W^T + b, tiled over the Nsongs axis --------
        xhat = pl.pallas_call(
            decoder_kernel,
            out_shape=jax.ShapeDtypeStruct((B, Nsongs), jnp.float32),
            grid_spec=pltpu.PrefetchScalarGridSpec(
                num_scalar_prefetch=0,
                grid=(grid_n,),
                in_specs=[
                    pl.BlockSpec((B, D), lambda j: (0, 0)),            # h resident
                    pl.BlockSpec((None, D, tn), lambda j: (j, 0, 0)),  # weight stream
                    pl.BlockSpec((1, tn), lambda j: (0, j)),           # bias stream
                ],
                out_specs=pl.BlockSpec((B, tn), lambda j: (0, j)),
            ),
            compiler_params=pltpu.CompilerParams(
                dimension_semantics=("parallel",),
            ),
        )(h, w_tiles, b_pad)

        return xhat, None

    return forward


def _reference_f32(x, emb_table, inv_w, inv_b):
    emb_z = emb_table.at[0].set(0.0)
    h = jnp.take(emb_z, x + 1, axis=0).sum(axis=1)
    nitems = jnp.sum((x != 0).astype(jnp.float32), axis=1)
    h = h / nitems[:, None]
    return h @ inv_w.T + inv_b


def _reference_bf16(x, emb_table, inv_w, inv_b):
    # Same math the kernel performs (bf16 operands, f32 accumulate).
    emb_z = emb_table.at[0].set(0.0)
    h = jnp.take(emb_z, x + 1, axis=0).sum(axis=1)
    nitems = jnp.sum((x != 0).astype(jnp.float32), axis=1)
    h = (h / nitems[:, None]).astype(jnp.bfloat16).astype(jnp.float32)
    w = inv_w.astype(jnp.bfloat16).astype(jnp.float32)
    return h @ w.T + inv_b


if __name__ == "__main__":
    # Small deterministic configs (stand-ins for Nsongs ~ 181k, emdim D=32):
    #  * (Nsongs=300, target_tile=128): 3-step grid + ragged (lane-masked) last
    #    output tile -> exercises the streaming pipeline and the edge masking.
    #  * (Nsongs=256, default target): single-tile path.
    D, B, S = 32, 2, 8
    key = jax.random.PRNGKey(0)

    for Nsongs, target_tile in [(300, 128), (256, 32 * 1024)]:
        k_emb, k_w, k_b, k_x = jax.random.split(jax.random.fold_in(key, Nsongs), 4)

        # nn.Embedding(Nsongs+1, D) with padding_idx=0
        emb_table = jax.random.normal(k_emb, (Nsongs + 1, D), dtype=jnp.float32)
        # nn.Linear(D, Nsongs): weight (Nsongs, D), bias (Nsongs,)
        inv_w = jax.random.normal(k_w, (Nsongs, D), dtype=jnp.float32) * 0.05
        # TODO(synk): original bias is copied from 'results/metadata/bias_inicialization';
        # here it is a deterministic random init instead of a checkpoint load.
        inv_b = jax.random.normal(k_b, (Nsongs,), dtype=jnp.float32) * 0.01

        # Input playlists: indices in [1, Nsongs); one explicit 0 to exercise
        # the Nitems = (x != 0) counting path.
        x = jax.random.randint(k_x, (B, S), 1, Nsongs, dtype=jnp.int32)
        x = x.at[0, 0].set(0)

        forward = make_model(emb_table, inv_w, inv_b, target_tile=target_tile)
        xhat, none_out = jax.jit(forward)(x)
        xhat = jax.block_until_ready(xhat)

        assert none_out is None
        assert xhat.shape == (B, Nsongs)

        # Tight check against the exact math the kernel performs (bf16 W and h).
        ref_bf16 = _reference_bf16(x, emb_table, inv_w, inv_b)
        assert jnp.max(jnp.abs(xhat - ref_bf16)) < 1e-3
        # Loose check against the pure-f32 module reference.
        ref_f32 = _reference_f32(x, emb_table, inv_w, inv_b)
        assert jnp.max(jnp.abs(xhat - ref_f32)) < 1e-2

    print("KERNEL_OK")
</pallas_src>

<mosaic_0001>
module attributes {stable_mosaic.version = 11 : i64} {
  func.func @decoder_kernel(%arg0: i32, %arg1: memref<2x32xbf16, #tpu.memory_space<vmem>>, %arg2: memref<1x32x128xbf16, #tpu.memory_space<vmem>>, %arg3: memref<1x128xf32, #tpu.memory_space<vmem>>, %arg4: memref<2x128xf32, #tpu.memory_space<vmem>>) attributes {dimension_semantics = [#tpu.dimension_semantics<parallel>], iteration_bounds = array<i64: 3>, scalar_prefetch = 0 : i64, scratch_operands = 0 : i64, tpu.core_type = #tpu.core_type<tc>, window_params = [{pipeline_mode = #tpu.pipeline_mode<synchronous>, transform_indices = @transform_0, window_bounds = array<i64: 2, 32>}, {transform_indices = @transform_1, window_bounds = array<i64: 1, 32, 128>}, {transform_indices = @transform_2, window_bounds = array<i64: 1, 128>}, {transform_indices = @transform_3, window_bounds = array<i64: 2, 128>}]} {
    %c0 = arith.constant 0 : index
    %c0_0 = arith.constant 0 : index
    %0 = vector.load %arg1[%c0, %c0_0] : memref<2x32xbf16, #tpu.memory_space<vmem>>, vector<2x32xbf16>
    %c0_1 = arith.constant 0 : index
    %c0_2 = arith.constant 0 : index
    %c0_3 = arith.constant 0 : index
    %1 = vector.load %arg2[%c0_1, %c0_2, %c0_3] : memref<1x32x128xbf16, #tpu.memory_space<vmem>>, vector<1x32x128xbf16>
    %2 = vector.shape_cast %1 : vector<1x32x128xbf16> to vector<32x128xbf16>
    %cst = arith.constant dense<0.000000e+00> : vector<2x128xf32>
    %3 = tpu.matmul %0, %2, %cst {dimension_numbers = #tpu.dot_dimension_numbers<[1], [0], [0], [1], [0, 0, 1, 1], [], []>} : vector<2x32xbf16>, vector<32x128xbf16>, vector<2x128xf32> -> vector<2x128xf32>
    %c0_4 = arith.constant 0 : index
    %c0_5 = arith.constant 0 : index
    %4 = vector.load %arg3[%c0_4, %c0_5] : memref<1x128xf32, #tpu.memory_space<vmem>>, vector<1x128xf32>
    %5 = vector.broadcast %4 : vector<1x128xf32> to vector<2x128xf32>
    %6 = arith.addf %3, %5 : vector<2x128xf32>
    %c0_6 = arith.constant 0 : index
    %c0_7 = arith.constant 0 : index
    %7 = vector.load %arg4[%c0_6, %c0_7] : memref<2x128xf32, #tpu.memory_space<vmem>>, vector<2x128xf32>
    tpu.vector_store %arg4[%c0_6, %c0_7], %6 {strides = array<i32>} : memref<2x128xf32, #tpu.memory_space<vmem>>, vector<2x128xf32>,
    return
  }
  func.func @transform_0(%arg0: i32) -> (i32, i32) {
    %c0_i32 = arith.constant 0 : i32
    %c0_i32_0 = arith.constant 0 : i32
    %c0_i32_1 = arith.constant 0 : i32
    return %c0_i32, %c0_i32_0 : i32, i32
  }
  func.func @transform_1(%arg0: i32) -> (i32, i32, i32) {
    %c0_i32 = arith.constant 0 : i32
    %c0_i32_0 = arith.constant 0 : i32
    %c0_i32_1 = arith.constant 0 : i32
    return %arg0, %c0_i32, %c0_i32_0 : i32, i32, i32
  }
  func.func @transform_2(%arg0: i32) -> (i32, i32) {
    %c0_i32 = arith.constant 0 : i32
    %c0_i32_0 = arith.constant 0 : i32
    return %c0_i32, %arg0 : i32, i32
  }
  func.func @transform_3(%arg0: i32) -> (i32, i32) {
    %c0_i32 = arith.constant 0 : i32
    %c0_i32_0 = arith.constant 0 : i32
    return %c0_i32, %arg0 : i32, i32
  }
}

</mosaic_0001>

<bundles_post_ra>
// kernel: forward.1
= control target key start
LH: loop header
LB: loop body
LE: loop exit
PB: predicated region body
PF: predicated region fallthrough
CT: control target
= control target key end

     0   :  { %8 = vsyncpa [#allocation3], 0  ;;  %s595_s0 = inlined_call_operand.vmem [shape: bf16[2,32], index: 0, kind: input, shape index: {}]   ;;  %s596_s1 = inlined_call_operand.vmem [shape: bf16[3,32,128], index: 1, kind: input, shape index: {}]   ;;  %s597_s2 = inlined_call_operand.vmem [shape: f32[1,384], index: 2, kind: input, shape index: {}]   ;;  %s598_s3 = inlined_call_operand.hbm [shape: f32[2,300], index: 3, kind: output, shape index: {}]  }
   0x1   :  { %10 = vsyncpa [#allocation3 + $0x1], 0  ;;  %s490_s12 = smov 0   ;;  %s492_s13 = smov 0  }
   0x2   :  { %s494_s14 = smov 0   ;;  %s496_s15 = smov 0  }
   0x3 LB: > { %s511_s16 = sadd.s32 4294967295, %s465_s15   ;;  %s335_s17 = sadd.s32 4294967294, %s465_s15   ;;  %s465_s15 = sphi %s496_s15, %s604_s15   ;;  %s461_s14 = sphi %s494_s14, %s603_s14   ;;  %s457_s13 = sphi %s492_s13, %s602_s13   ;;  %s453_s12 = sphi %s490_s12, %s601_s12  }
   0x4   : > { %s515_s18 = sadd.s32 1, %s465_s15   ;;  %s96_s19 = sadd.s32 1, %s461_s14 }
   0x5   : > { %s93_s20 = ssub.s32 %s465_s15, %s515_s18  ;;  %p106_p0 = scmp.ne.s32.totalorder %s461_s14, %s457_s13 }
   0x6   : > { %p94_p1 = scmp.eq.s32.totalorder %s93_s20, 0  ;;  %p107_p2 = scmp.eq.s32.totalorder %s511_s16, 2 }
   0x7   : > { %p112_p3 = scmp.ne.s32.totalorder %s457_s13, %s453_s12  ;;  %p113_p4 = scmp.eq.s32.totalorder %s335_s17, 2 }
   0x8   : > { %s526_s21 = scalar_select %p94_p1, %s461_s14, %s96_s19  }
   0x9   : > { %p528_p5 = por %p107_p2, %p106_p0  ;;  %p532_p6 = por %p113_p4, %p112_p3 }
   0xa   : > { %p338_p7 = scmp.ge.s32.totalorder %s465_s15, 1  ;;  %p148_p8 = scmp.lt.s32.totalorder %s465_s15, 4 }
   0xc   : > { %p149_p9 = pnand %p338_p7, %p148_p8 }
   0xd   : > { %p175_p10 = scmp.lt.s32.totalorder (!%p149_p9), %s511_s16, 2  ;;  %s172_s4 = sand.u32 (!%p149_p9), 1, %s457_s13  }
   0xe   : > { %152 = sbr.rel (%p149_p9) target bundleno = 240 (0xf0), region = 32  ;;  %s339_s5 = sshll.u32 (!%p149_p9), %s172_s4, 1 }
   0xf   : > { %s347_s9 = sshll.u32 (!%p149_p9), %s511_s16, 5  ;;  %s174_s10 = scalar_lea.vmem (!%p149_p9), [#allocation2], %s339_s5 }
  0x10   : > { %s267_s11 = sshll.u32 (!%p149_p9), %s174_s10, 4  ;;  %s554_s20 = scalar_lea.hbm (!%p149_p9), %s598_s3, %s347_s9  ;;  %s556_s11 = int_to_ptr.vmem [resolvable:$true] %s267_s11 }
  0x13   : > { %v467_v0 = vmov 0.0   ;;  %vm468_vm0 = vmmov 0   ;;  %s176_s24 = scalar_select %p175_p10, %s511_s16, 2  ;;  %v184_v3 = vld [vmem:[%s595_s0] sm:$0x1]  ;;  %vm208_vm1 = vcmask 261120  }
  0x14   : > { %354 = vmatprep.subr.bf16.mxu0 %v467_v0  ;;  %358 = vmatprep.mubr.msk.bf16.mxu0 %vm468_vm0, %v467_v0  ;;  %s469_s16 = smov [#allocation2]  }
  0x15   : > { %s350_s25 = sshll.u32 %s176_s24, 4  ;;  %s182_s8 = scalar_lea.vmem %s597_s2, %s176_s24 }
  0x16   : > { %s179_s28 = scalar_lea.vmem %s596_s1, %s350_s25  ;;  %v342_v4 = vld [vmem:[%s182_s8] ss:$0 sm:$0xff]  ;;  %s254_s24 = scalar_lea.sflag [#allocation3], %s172_s4 }
  0x17   : > { %v403_v1 = vld [vmem:[%s179_s28 + $0x8] sm:$0xff]   ;;  %v404_v2 = vld [vmem:[%s179_s28] sm:$0xff]   ;;  %s405_s25 = scalar_lea.vmem %s556_s11, 32  ;;  %s409_s26 = sshll.u32 %s469_s16, 4  ;;  %s410_s26 = int_to_ptr.vmem [resolvable:$false] %s409_s26 }
  0x18   : > { %355 = vmatpush3.bf16.msra.mxu0 %v403_v1  ;;  %p406_p11 = scmp.ne.s32.totalorder %s556_s11, %s405_s25  ;;  %s411_s27 = scalar_lea.vmem %s410_s26, 64 }
  0x19   : > { %356 = vmatprep.subr.bf16.mxu0 %v467_v0  ;;  %p412_p0 = scmp.lt.s32.totalorder %s556_s11, %s410_s26  ;;  %p413_p1 = scmp.lt.s32.totalorder %s411_s27, %s405_s25 }
  0x1a   : > { %p407_p12 = pnand %p406_p11, %p528_p5 }
  0x1b   : > { %p414_p2 = por %p413_p1, %p412_p0 }
  0x1c   : > { %357 = vmatpush3.bf16.msra.mxu0 %v404_v2  ;;  %p408_p13 = pneg %p407_p12 }
  0x1e   : > { %p415_p3 = pnand %p414_p2, %p408_p13 }
  0x1f   : > { %359 = vmatmul.mubr.msk.bf16.vlgmr.msra.gmra.mxu0 %vm208_vm1, %v184_v3 }
  0xdf   : > { %v246_v5 = vpop.f32.mrf.mxu0 }
  0xe0   : > { %v247_v6 = vadd.f32 %v342_v4, %v246_v5 }
  0xe1   : > { %v360_v7 = vpop.f32.mrf.mxu0 }
  0xe2   : > { %252 = vst [vmem:[%s174_s10] sm:$0x3] %v247_v6 }
  0xe3   : > { %v249_v8 = vpop.f32.mrf.mxu0 }
  0xe4   : > { %418 = shalt.err (!%p415_p3)
}
  0xe5   : > { %s419_s28 = scalar_lea.hbm %s554_s20, 32  ;;  %s423_s4 = scalar_lea.hbm %s598_s3, 96 }
  0xe6   : > { %p420_p4 = scmp.ne.s32.totalorder %s554_s20, %s419_s28  ;;  %p424_p9 = scmp.lt.s32.totalorder %s554_s20, %s598_s3 }
  0xe7   : > { %p425_p10 = scmp.lt.s32.totalorder %s423_s4, %s419_s28 }
  0xe8   : > { %p421_p7 = pnand %p420_p4, %p528_p5 }
  0xe9   : > { %p426_p11 = por %p425_p10, %p424_p9 }
  0xea   : > { %p422_p8 = pneg %p421_p7 }
  0xec   : > { %p427_p12 = pnand %p426_p11, %p422_p8 }
  0xee   : > { %430 = shalt.err (!%p427_p12)
}
  0xef   : > { %362 = dma.vmem_to_hbm [thread:$0]  (%p528_p5), %s556_s11, 32, %s554_s20, %s254_s24   ;;  %v361_v9 = vpop.f32.mrf.mxu0 }
  0xf0 PF: > { %p368_p13 = scmp.ge.s32.totalorder %s465_s15, 2  ;;  %s279_s7 = sand.u32 1, %s453_s12  }
  0xf1   : > { %s280_s8 = scalar_lea.sflag [#allocation3], %s279_s7 }
  0xf2   : > { %p365_p0 = pnand %p368_p13, %p532_p6 }
  0xf4   : > { %p366_p1 = pneg %p365_p0 }
  0xf6   : > { %448 = dma.done.wait (%p366_p1), %s280_s8, 32  }
  0xf7   : > { %450 = vsyncadd (%p366_p1), %s280_s8, 4294967264  ;;  %p13_p2 = scmp.ge.s32.totalorder %s515_s18, 5   ;;  %s601_s12 = smov %s457_s13 }
  0xf8   : > { %s602_s13 = smov %s461_s14  ;;  %s603_s14 = smov %s526_s21 }
  0xf9   : > { %s604_s15 = smov %s515_s18  ;;  %15 = sbr.rel (!%p13_p2) target bundleno = 3 (0x3), region = 70 }
  0xfe   :  { %285 = vsyncpa [#allocation3], 1 }
  0xff   :  { %287 = vsyncpa [#allocation3 + $0x1], 1 }

</bundles_post_ra>
